<compile_context>
chip_gen: v7x
topology: tpu7x:2x2x1
jax: 0.10.0
libtpu: 0.0.40
codegen_flags: <defaults>
</compile_context>

<pallas_src>
import jax
import jax.numpy as jnp
from jax.experimental import pallas as pl
from jax.experimental.pallas import tpu as pltpu

C_SQ = 32    # channels of x50 (squeeze input)
C_MID = 120  # channels of x48 / conv2d17 output
C_OUT = 40   # conv2d18 output channels


def se_kernel(x50_ref, w1t_ref, b1_ref, x_ref, w2_ref, o_ref):
    # x50_ref: (1, 32) f32     w1t_ref: (32, 120) f32    b1_ref: (1, 120) f32
    # x_ref:   (120, HW) bf16  w2_ref:  (40, 120) f32    o_ref:  (40, HW) f32
    v = jnp.maximum(x50_ref[...], 0.0)                                   # ReLU, (1, 32)
    # s = hardsigmoid(v @ W1^T + b1) in row layout (1, 120): 1-row MXU push,
    # bias add at full lane occupancy.
    z = jnp.dot(v, w1t_ref[...], preferred_element_type=jnp.float32)     # (1, 120)
    z = z + b1_ref[...]
    s = jnp.clip(z * (1.0 / 6.0) + 0.5, 0.0, 1.0)                        # Hardsigmoid
    # Fold the channel scale into W2 (tiny, f32) instead of scaling the big
    # activation; cast the scaled weights to bf16 for the MXU.
    w2s = (w2_ref[...] * s).astype(jnp.bfloat16)                         # (40, 120)
    o_ref[...] = jnp.dot(w2s, x_ref[...],
                         preferred_element_type=jnp.float32)             # (40, HW), lane-dense


def se_block(x50, x48, w1, b1, w2):
    """x50: (N, 32, 1, 1) f32, x48: (N, 120, H, W); returns (N, 40, H, W) f32."""
    N, C_in, H, W = x48.shape
    assert C_in == C_MID
    assert x50.shape == (N, C_SQ, 1, 1)
    HW = H * W

    # Pure views / trivial reshapes only on the big activation; bf16 cast on x48
    # halves its HBM read (in a full network this cast fuses into the producer).
    x_cp = x48.reshape(N, C_MID, HW).astype(jnp.bfloat16)   # channel-major pixels
    x50_r = x50.reshape(N, 1, C_SQ)
    w1t = w1.reshape(C_MID, C_SQ).T                          # (32, 120), tiny
    b1_row = b1.reshape(1, C_MID)                            # (1, 120)
    w2_r = w2.reshape(C_OUT, C_MID)                          # (40, 120), f32

    out = pl.pallas_call(
        se_kernel,
        out_shape=jax.ShapeDtypeStruct((N, C_OUT, HW), jnp.float32),
        grid=(N,),  # one step per image (N=1 for this module -> single step)
        in_specs=[
            pl.BlockSpec((pl.Squeezed(), 1, C_SQ), lambda n: (n, 0, 0)),     # x50
            pl.BlockSpec((C_SQ, C_MID), lambda n: (0, 0)),                   # W1^T
            pl.BlockSpec((1, C_MID), lambda n: (0, 0)),                      # b1 row
            pl.BlockSpec((pl.Squeezed(), C_MID, HW), lambda n: (n, 0, 0)),   # x48 (image n)
            pl.BlockSpec((C_OUT, C_MID), lambda n: (0, 0)),                  # W2
        ],
        out_specs=pl.BlockSpec((pl.Squeezed(), C_OUT, HW), lambda n: (n, 0, 0)),
        compiler_params=pltpu.CompilerParams(
            dimension_semantics=("parallel",)),
    )(x50_r, w1t, b1_row, x_cp, w2_r)

    return out.reshape(N, C_OUT, H, W)      # view reshape only, already NCHW


def reference(x50, x48, w1, b1, w2):
    x51 = jnp.maximum(x50, 0.0)
    x52 = jnp.einsum('nchw,oc->nohw', x51, w1.reshape(C_MID, C_SQ)) \
        + b1.reshape(1, C_MID, 1, 1)
    x53 = jnp.clip(x52 / 6.0 + 0.5, 0.0, 1.0)
    x54 = x53 * x48
    x55 = jnp.einsum('nchw,oc->nohw', x54, w2.reshape(C_OUT, C_MID))
    return x55


if __name__ == "__main__":
    key = jax.random.PRNGKey(0)
    k1, k2, k3, k4, k5 = jax.random.split(key, 5)

    # shapes implied by the module
    x50 = jax.random.normal(k1, (1, C_SQ, 1, 1), dtype=jnp.float32)
    x48 = jax.random.normal(k2, (1, C_MID, 28, 28), dtype=jnp.float32)

    # deterministic parameter init (conv2d17: 32->120 with bias, conv2d18: 120->40 no bias)
    w1 = jax.random.normal(k3, (C_MID, C_SQ, 1, 1), dtype=jnp.float32) * 0.1
    b1 = jax.random.normal(k4, (C_MID,), dtype=jnp.float32) * 0.1
    w2 = jax.random.normal(k5, (C_OUT, C_MID, 1, 1), dtype=jnp.float32) * 0.1

    out = se_block(x50, x48, w1, b1, w2)
    out = jax.block_until_ready(out)

    ref = reference(x50, x48, w1, b1, w2)
    assert out.shape == (1, C_OUT, 28, 28)
    # bf16 matmul operands (f32 accumulation) -> loosened tolerance vs f32 reference
    assert jnp.allclose(out, ref, atol=3e-2, rtol=3e-2), \
        float(jnp.max(jnp.abs(out - ref)))

    print("KERNEL_OK")
</pallas_src>

<mosaic_0001>
module attributes {stable_mosaic.version = 11 : i64} {
  func.func @se_kernel(%arg0: i32, %arg1: memref<1x1x32xf32, #tpu.memory_space<vmem>>, %arg2: memref<32x120xf32, #tpu.memory_space<vmem>>, %arg3: memref<1x120xf32, #tpu.memory_space<vmem>>, %arg4: memref<1x120x784xbf16, #tpu.memory_space<vmem>>, %arg5: memref<40x120xf32, #tpu.memory_space<vmem>>, %arg6: memref<1x40x784xf32, #tpu.memory_space<vmem>>) attributes {dimension_semantics = [#tpu.dimension_semantics<parallel>], iteration_bounds = array<i64: 1>, scalar_prefetch = 0 : i64, scratch_operands = 0 : i64, tpu.core_type = #tpu.core_type<tc>, window_params = [{transform_indices = @transform_0, window_bounds = array<i64: 1, 1, 32>}, {pipeline_mode = #tpu.pipeline_mode<synchronous>, transform_indices = @transform_1, window_bounds = array<i64: 32, 120>}, {pipeline_mode = #tpu.pipeline_mode<synchronous>, transform_indices = @transform_2, window_bounds = array<i64: 1, 120>}, {transform_indices = @transform_3, window_bounds = array<i64: 1, 120, 784>}, {pipeline_mode = #tpu.pipeline_mode<synchronous>, transform_indices = @transform_4, window_bounds = array<i64: 40, 120>}, {transform_indices = @transform_5, window_bounds = array<i64: 1, 40, 784>}]} {
    %c0 = arith.constant 0 : index
    %c0_0 = arith.constant 0 : index
    %c0_1 = arith.constant 0 : index
    %0 = vector.load %arg1[%c0, %c0_0, %c0_1] : memref<1x1x32xf32, #tpu.memory_space<vmem>>, vector<1x1x32xf32>
    %1 = vector.shape_cast %0 : vector<1x1x32xf32> to vector<1x32xf32>
    %cst = arith.constant 0.000000e+00 : f32
    %2 = vector.broadcast %cst : f32 to vector<1x32xf32>
    %3 = arith.maximumf %1, %2 : vector<1x32xf32>
    %c0_2 = arith.constant 0 : index
    %c0_3 = arith.constant 0 : index
    %4 = vector.load %arg2[%c0_2, %c0_3] : memref<32x120xf32, #tpu.memory_space<vmem>>, vector<32x120xf32>
    %cst_4 = arith.constant dense<0.000000e+00> : vector<1x120xf32>
    %5 = tpu.matmul %3, %4, %cst_4 {dimension_numbers = #tpu.dot_dimension_numbers<[1], [0], [0], [1], [0, 0, 1, 1], [], []>} : vector<1x32xf32>, vector<32x120xf32>, vector<1x120xf32> -> vector<1x120xf32>
    %c0_5 = arith.constant 0 : index
    %c0_6 = arith.constant 0 : index
    %6 = vector.load %arg3[%c0_5, %c0_6] : memref<1x120xf32, #tpu.memory_space<vmem>>, vector<1x120xf32>
    %7 = arith.addf %5, %6 : vector<1x120xf32>
    %cst_7 = arith.constant 0.166666672 : f32
    %8 = vector.broadcast %cst_7 : f32 to vector<1x120xf32>
    %9 = arith.mulf %7, %8 : vector<1x120xf32>
    %cst_8 = arith.constant 5.000000e-01 : f32
    %10 = vector.broadcast %cst_8 : f32 to vector<1x120xf32>
    %11 = arith.addf %9, %10 : vector<1x120xf32>
    %cst_9 = arith.constant 0.000000e+00 : f32
    %cst_10 = arith.constant 1.000000e+00 : f32
    %12 = vector.broadcast %cst_9 : f32 to vector<1x120xf32>
    %13 = arith.maximumf %12, %11 : vector<1x120xf32>
    %14 = vector.broadcast %cst_10 : f32 to vector<1x120xf32>
    %15 = arith.minimumf %14, %13 : vector<1x120xf32>
    %c0_11 = arith.constant 0 : index
    %c0_12 = arith.constant 0 : index
    %16 = vector.load %arg5[%c0_11, %c0_12] : memref<40x120xf32, #tpu.memory_space<vmem>>, vector<40x120xf32>
    %17 = vector.broadcast %15 : vector<1x120xf32> to vector<40x120xf32>
    %18 = arith.mulf %16, %17 : vector<40x120xf32>
    %19 = arith.truncf %18 : vector<40x120xf32> to vector<40x120xbf16>
    %c0_13 = arith.constant 0 : index
    %c0_14 = arith.constant 0 : index
    %c0_15 = arith.constant 0 : index
    %20 = vector.load %arg4[%c0_13, %c0_14, %c0_15] : memref<1x120x784xbf16, #tpu.memory_space<vmem>>, vector<1x120x784xbf16>
    %21 = vector.shape_cast %20 : vector<1x120x784xbf16> to vector<120x784xbf16>
    %cst_16 = arith.constant dense<0.000000e+00> : vector<40x784xf32>
    %22 = tpu.matmul %19, %21, %cst_16 {dimension_numbers = #tpu.dot_dimension_numbers<[1], [0], [0], [1], [0, 0, 1, 1], [], []>} : vector<40x120xbf16>, vector<120x784xbf16>, vector<40x784xf32> -> vector<40x784xf32>
    %c0_17 = arith.constant 0 : index
    %c0_18 = arith.constant 0 : index
    %c0_19 = arith.constant 0 : index
    %23 = vector.load %arg6[%c0_17, %c0_18, %c0_19] : memref<1x40x784xf32, #tpu.memory_space<vmem>>, vector<1x40x784xf32>
    %24 = vector.shape_cast %23 : vector<1x40x784xf32> to vector<40x784xf32>
    %25 = vector.shape_cast %22 : vector<40x784xf32> to vector<1x40x784xf32>
    tpu.vector_store %arg6[%c0_17, %c0_18, %c0_19], %25 {strides = array<i32>} : memref<1x40x784xf32, #tpu.memory_space<vmem>>, vector<1x40x784xf32>,
    return
  }
  func.func @transform_0(%arg0: i32) -> (i32, i32, i32) {
    %c0_i32 = arith.constant 0 : i32
    %c0_i32_0 = arith.constant 0 : i32
    %c0_i32_1 = arith.constant 0 : i32
    return %arg0, %c0_i32, %c0_i32_0 : i32, i32, i32
  }
  func.func @transform_1(%arg0: i32) -> (i32, i32) {
    %c0_i32 = arith.constant 0 : i32
    %c0_i32_0 = arith.constant 0 : i32
    %c0_i32_1 = arith.constant 0 : i32
    return %c0_i32, %c0_i32_0 : i32, i32
  }
  func.func @transform_2(%arg0: i32) -> (i32, i32) {
    %c0_i32 = arith.constant 0 : i32
    %c0_i32_0 = arith.constant 0 : i32
    %c0_i32_1 = arith.constant 0 : i32
    return %c0_i32, %c0_i32_0 : i32, i32
  }
  func.func @transform_3(%arg0: i32) -> (i32, i32, i32) {
    %c0_i32 = arith.constant 0 : i32
    %c0_i32_0 = arith.constant 0 : i32
    %c0_i32_1 = arith.constant 0 : i32
    return %arg0, %c0_i32, %c0_i32_0 : i32, i32, i32
  }
  func.func @transform_4(%arg0: i32) -> (i32, i32) {
    %c0_i32 = arith.constant 0 : i32
    %c0_i32_0 = arith.constant 0 : i32
    %c0_i32_1 = arith.constant 0 : i32
    return %c0_i32, %c0_i32_0 : i32, i32
  }
  func.func @transform_5(%arg0: i32) -> (i32, i32, i32) {
    %c0_i32 = arith.constant 0 : i32
    %c0_i32_0 = arith.constant 0 : i32
    %c0_i32_1 = arith.constant 0 : i32
    return %arg0, %c0_i32, %c0_i32_0 : i32, i32, i32
  }
}

</mosaic_0001>

<bundles_post_ra>
// kernel: tpu_custom_call.1
= control target key start
LH: loop header
LB: loop body
LE: loop exit
PB: predicated region body
PF: predicated region fallthrough
CT: control target
= control target key end

     0   :  { %v1018_v3 = vmov 0.0|0.0   ;;  %vm1019_vm0 = vmmov 0   ;;  %v1020_v6 = vmov 0.0   ;;  %vm29_vm1 = vcmask 261120   ;;  %s1321_s0 = inlined_call_operand.vmem [shape: f32[1,1,32], index: 0, kind: input, shape index: {}]   ;;  %s1322_s1 = inlined_call_operand.vmem [shape: f32[32,120], index: 1, kind: input, shape index: {}]   ;;  %s1323_s2 = inlined_call_operand.vmem [shape: f32[1,120], index: 2, kind: input, shape index: {}]   ;;  %s1324_s3 = inlined_call_operand.vmem [shape: bf16[1,120,784], index: 3, kind: input, shape index: {}]   ;;  %s1325_s4 = inlined_call_operand.vmem [shape: f32[40,120], index: 4, kind: input, shape index: {}]   ;;  %s1326_s5 = inlined_call_operand.hbm [shape: f32[1,40,784], index: 5, kind: output, shape index: {}]  }
   0x1   :  { %v24_v0 = vld [vmem:[%s1322_s1] sm:$0xff]  ;;  %v25_v1 = vld [vmem:[%s1322_s1 + $0x8] sm:$0xff]  ;;  %v26_v2 = vld [vmem:[%s1322_s1 + $0x10] sm:$0xff]  ;;  %904 = vmatprep.subr.bf16.mxu0 %v1018_v3  ;;  %873 = vmatprep.mubr.msk.f32.mxu0 %vm1019_vm0, %v1020_v6 }
   0x2   :  { %v905_v4 = vpack.c.bf16 %v25_v1, %v24_v0  ;;  %v27_v5 = vld [vmem:[%s1322_s1 + $0x18] sm:$0xff]  ;;  %v917_v7 = vld [vmem:[%s1324_s3 + $0x4] ss:$28 sps:$4 sm:$0xff]   ;;  %v921_v10 = vld [vmem:[%s1324_s3 + $0xc] ss:$28 sps:$4 sm:$0xff]  }
   0x3   :  { %v908_v8 = vpack.c.bf16 %v27_v5, %v26_v2  ;;  %v22_v9 = vld [vmem:[%s1321_s0] sm:$0x1]  ;;  %486 = vmatprep.subr.bf16.mxu1 %v917_v7  ;;  %v923_v12 = vld [vmem:[%s1324_s3 + $0x3c] ss:$28 sps:$4 sm:$0xff]   ;;  %v919_v14 = vld [vmem:[%s1324_s3 + $0x8] ss:$28 sps:$4 sm:$0xff]  }
   0x4   :  { %906 = vmatpush3.bf16.msra.mxu0 %v905_v4  ;;  %v922_v11 = vld [vmem:[%s1324_s3] ss:$28 sps:$4 sm:$0xff]   ;;  %v23_v13 = vmax.f32 %v22_v9, 0.0  ;;  %v928_v15 = vld [vmem:[%s1324_s3 + $0x38] ss:$28 sps:$4 sm:$0xff]  }
   0x5   :  { %907 = vmatprep.subr.bf16.mxu0 %v1018_v3  ;;  %487 = vmatpush1.bf16.msra.mxu1 %v922_v11  ;;  %v929_v16 = vld [vmem:[%s1324_s3 + $0x74] ss:$28 sps:$4 sm:$0xff]   ;;  %v927_v17 = vld [vmem:[%s1324_s3 + $0x44] ss:$28 sps:$4 sm:$0xff]   ;;  %v935_v20 = vld [vmem:[%s1324_s3 + $0xac] ss:$28 sps:$4 sm:$0xff]  }
   0x6   :  { %488 = vmatprep.subr.bf16.mxu1 %v923_v12  ;;  %v934_v18 = vld [vmem:[%s1324_s3 + $0x70] ss:$28 sps:$4 sm:$0xff]   ;;  %v925_v19 = vld [vmem:[%s1324_s3 + $0x40] ss:$28 sps:$4 sm:$0xff]   ;;  %v940_v22 = vld [vmem:[%s1324_s3 + $0xa8] ss:$28 sps:$4 sm:$0xff]  }
   0x7   :  { %v933_v21 = vld [vmem:[%s1324_s3 + $0x7c] ss:$28 sps:$4 sm:$0xff]   ;;  %v939_v24 = vld [vmem:[%s1324_s3 + $0xb4] ss:$28 sps:$4 sm:$0xff]  }
   0x8   :  { %909 = vmatpush3.bf16.msra.mxu0 %v908_v8  ;;  %v931_v23 = vld [vmem:[%s1324_s3 + $0x78] ss:$28 sps:$4 sm:$0xff]   ;;  %v937_v25 = vld [vmem:[%s1324_s3 + $0xb0] ss:$28 sps:$4 sm:$0xff]  }
   0x9   :  { %547 = vmatprep.subr.bf16.mxu0 %v921_v10  ;;  %489 = vmatpush1.bf16.msra.mxu1 %v928_v15 }
   0xa   :  { %490 = vmatprep.subr.bf16.mxu1 %v929_v16 }
   0xb   :  { %874 = vmatmul.mubr.msk.f32.vlgmr.msra.gmra.mrb[0].mxu0 %vm29_vm1, %v23_v13 }
   0xc   :  { %548 = vmatpush1.bf16.msra.mxu0 %v919_v14 }
   0xd   :  { %549 = vmatprep.subr.bf16.mxu0 %v927_v17  ;;  %491 = vmatpush1.bf16.msra.mxu1 %v934_v18 }
   0xe   :  { %492 = vmatprep.subr.bf16.mxu1 %v935_v20 }
  0x10   :  { %550 = vmatpush1.bf16.msra.mxu0 %v925_v19 }
  0x11   :  { %551 = vmatprep.subr.bf16.mxu0 %v933_v21  ;;  %493 = vmatpush1.bf16.msra.mxu1 %v940_v22 }
  0x14   :  { %552 = vmatpush1.bf16.msra.mxu0 %v931_v23 }
  0x15   :  { %553 = vmatprep.subr.bf16.mxu0 %v939_v24 }
  0x18   :  { %554 = vmatpush1.bf16.msra.mxu0 %v937_v25 }
  0x19   :  { %10 = vsyncpa [#allocation3], 0  ;;  %v941_v26 = vld [vmem:[%s1324_s3 + $0xe4] ss:$28 sps:$4 sm:$0xff]   ;;  %v945_v27 = vld [vmem:[%s1324_s3 + $0xec] ss:$28 sps:$4 sm:$0xff]   ;;  %v112_v49 = vlaneseq }
  0x1a   :  { %v943_v28 = vld [vmem:[%s1324_s3 + $0xe8] ss:$28 sps:$4 sm:$0xff]   ;;  %v946_v29 = vld [vmem:[%s1324_s3 + $0xe0] ss:$28 sps:$4 sm:$0xff]   ;;  %494 = vmatprep.subr.bf16.mxu1 %v941_v26  ;;  %555 = vmatprep.subr.bf16.mxu0 %v945_v27  ;;  %v952_v33 = vld [vmem:[%s1324_s3 + $0x118] ss:$28 sps:$4 sm:$0xff]  }
  0x1b   :  { %495 = vmatpush1.bf16.msra.mxu1 %v946_v29  ;;  %v947_v30 = vld [vmem:[%s1324_s3 + $0x11c] ss:$28 sps:$4 sm:$0xff]   ;;  %v951_v31 = vld [vmem:[%s1324_s3 + $0x124] ss:$28 sps:$4 sm:$0xff]   ;;  %v953_v34 = vld [vmem:[%s1324_s3 + $0x154] ss:$28 sps:$4 sm:$0xff]  }
  0x1c   :  { %556 = vmatpush1.bf16.msra.mxu0 %v943_v28  ;;  %v949_v32 = vld [vmem:[%s1324_s3 + $0x120] ss:$28 sps:$4 sm:$0xff]   ;;  %496 = vmatprep.subr.bf16.mxu1 %v947_v30  ;;  %v955_v36 = vld [vmem:[%s1324_s3 + $0x158] ss:$28 sps:$4 sm:$0xff]   ;;  %v958_v37 = vld [vmem:[%s1324_s3 + $0x150] ss:$28 sps:$4 sm:$0xff]  }
  0x1d   :  { %557 = vmatprep.subr.bf16.mxu0 %v951_v31  ;;  %v957_v35 = vld [vmem:[%s1324_s3 + $0x15c] ss:$28 sps:$4 sm:$0xff]   ;;  %v180_v38 = vld [vmem:[%s1324_s3 + $0x188] sm:$0xff]  ;;  %v181_v39 = vld [vmem:[%s1324_s3 + $0x190] sm:$0xff]  ;;  %vm464_vm2 = vcmask 1043456   ;;  %v1021_v47 = vmov 0  }
  0x1e   :  { %v828_v40 = vcombine.high %v180_v38, %v180_v38  ;;  %v830_v41 = vcombine.high %v181_v39, %v181_v39  ;;  %v827_v42 = vcombine.low %v180_v38, %v180_v38  ;;  %v829_v43 = vcombine.low %v181_v39, %v181_v39  ;;  %v965_v44 = vld [vmem:[%s1324_s3 + $0x14] ss:$28 sps:$4 sm:$0xff]   ;;  %518 = vmatprep.mubr.bf16.mxu1 %v1021_v47  ;;  %v28_v48 = vld [vmem:[%s1323_s2] sm:$0x1]  ;;  %v108_v60 = vld [vmem:[%s1325_s4 + $0x8] sm:$0xff] }
  0x1f   :  { %497 = vmatpush1.bf16.msra.mxu1 %v952_v33  ;;  %579 = vmatprep.mubr.bf16.mxu0 %v1021_v47  ;;  %v113_v54 = vshrl.u32 %v112_v49, 7  ;;  %v107_v59 = vld [vmem:[%s1325_s4] sm:$0xff]  ;;  %v963_v0 = vld [vmem:[%s1324_s3 + $0x10] ss:$28 sps:$4 sm:$0xff]   ;;  %vm454_vm3 = vcmask 982016   ;;  %v110_v5 = vld [vmem:[%s1325_s4 + $0x18] sm:$0xff] }
  0x20   :  { %558 = vmatpush1.bf16.msra.mxu0 %v949_v32  ;;  %498 = vmatprep.subr.bf16.mxu1 %v953_v34  ;;  %v466_v45 = vsel %vm464_vm2, %v827_v42, 0  ;;  %v472_v46 = vsel %vm464_vm2, %v829_v43, 0  ;;  %v966_v1 = vld [vmem:[%s1324_s3 + $0x18] ss:$28 sps:$4 sm:$0xff]   ;;  %v969_v3 = vld [vmem:[%s1324_s3 + $0x4c] ss:$28 sps:$4 sm:$0xff]  }
  0x21   :  { %559 = vmatprep.subr.bf16.mxu0 %v957_v35  ;;  %v114_v57 = vsub.s32 0, %v113_v54  ;;  %v109_v4 = vld [vmem:[%s1325_s4 + $0x10] sm:$0xff]  ;;  %v967_v7 = vld [vmem:[%s1324_s3 + $0x48] ss:$28 sps:$4 sm:$0xff]   ;;  %v971_v12 = vld [vmem:[%s1324_s3 + $0x80] ss:$28 sps:$4 sm:$0xff]  }
  0x22   :  { %v970_v8 = vld [vmem:[%s1324_s3 + $0x50] ss:$28 sps:$4 sm:$0xff]   ;;  %v973_v9 = vld [vmem:[%s1324_s3 + $0x84] ss:$28 sps:$4 sm:$0xff]   ;;  %v977_v15 = vld [vmem:[%s1324_s3 + $0xbc] ss:$28 sps:$4 sm:$0xff]  }
  0x23   :  { %499 = vmatpush1.bf16.msra.mxu1 %v958_v37  ;;  %v974_v13 = vld [vmem:[%s1324_s3 + $0x88] ss:$28 sps:$4 sm:$0xff]   ;;  %v975_v17 = vld [vmem:[%s1324_s3 + $0xb8] ss:$28 sps:$4 sm:$0xff]   ;;  %v978_v18 = vld [vmem:[%s1324_s3 + $0xc0] ss:$28 sps:$4 sm:$0xff]  }
  0x24   :  { %560 = vmatpush1.bf16.msra.mxu0 %v955_v36  ;;  %834 = vmatprep.subr.msk.bf16.mxu1 %vm464_vm2, %v828_v40  ;;  %v111_v16 = vld [vmem:[%s1325_s4 + $0x20] sm:$0xff]  ;;  %v981_v19 = vld [vmem:[%s1324_s3 + $0xf4] ss:$28 sps:$4 sm:$0xff]   ;;  %v985_v24 = vld [vmem:[%s1324_s3 + $0x12c] ss:$28 sps:$4 sm:$0xff]   ;;  %vm731_vm4 = vcmask 130048  }
  0x25   :  { %838 = vmatprep.subr.msk.bf16.mxu0 %vm464_vm2, %v830_v41  ;;  %v979_v21 = vld [vmem:[%s1324_s3 + $0xf0] ss:$28 sps:$4 sm:$0xff]   ;;  %v982_v22 = vld [vmem:[%s1324_s3 + $0xf8] ss:$28 sps:$4 sm:$0xff]   ;;  %v983_v25 = vld [vmem:[%s1324_s3 + $0x128] ss:$28 sps:$4 sm:$0xff]  }
  0x26   :  { %v986_v26 = vld [vmem:[%s1324_s3 + $0x130] ss:$28 sps:$4 sm:$0xff]   ;;  %v989_v27 = vld [vmem:[%s1324_s3 + $0x164] ss:$28 sps:$4 sm:$0xff]   ;;  %v182_v28 = vld [vmem:[%s1324_s3 + $0x198] sm:$0xff] }
  0x27   :  { %501 = vmatpush1.bf16.msra.mxu1 %v466_v45  ;;  %v987_v29 = vld [vmem:[%s1324_s3 + $0x160] ss:$28 sps:$4 sm:$0xff]   ;;  %v990_v30 = vld [vmem:[%s1324_s3 + $0x168] ss:$28 sps:$4 sm:$0xff]   ;;  %v832_v31 = vcombine.high %v182_v28, %v182_v28  ;;  %v831_v32 = vcombine.low %v182_v28, %v182_v28 }
  0x28   :  { %562 = vmatpush1.bf16.msra.mxu0 %v472_v46  ;;  %608 = vmatprep.subr.bf16.mxu1 %v965_v44  ;;  %v993_v33 = vld [vmem:[%s1324_s3 + $0x1a0] ss:$0 sps:$4 sm:$0xff]   ;;  %s1022_s3 = smov [#allocation2]  }
  0x29   :  { %876 = vmatprep.subr.bf16.mxu0 %v1020_v6  ;;  %v478_v34 = vsel %vm464_vm2, %v831_v32, 0  ;;  %v484_v35 = vsel %vm464_vm2, %v993_v33, 0  ;;  %s766_s9 = sshll.u32 %s1022_s3, 4  ;;  %s1301_s9 = int_to_ptr.vmem [resolvable:$true] %s766_s9 }
  0x2a   :  { %s994_s10 = scalar_lea.vmem %s1301_s9, 4480  ;;  %p999_p1 = scmp.lt.s32.totalorder %s1301_s9, %s1301_s9 }
  0x2b   :  { %p995_p0 = scmp.ne.s32.totalorder %s1301_s9, %s994_s10  ;;  %p1000_p2 = scmp.lt.s32.totalorder %s994_s10, %s994_s10 }
  0x2d   :  { %p1001_p3 = por %p1000_p2, %p999_p1 }
  0x2f   :  { %p1002_p4 = pnand %p1001_p3, %p995_p0 }
  0xde   :  { %v99_v50 = vpop.f32.mrb[0].mxu0 }
  0xdf   :  { %v100_v51 = vadd.f32 %v99_v50, %v28_v48  ;;  %v875_v52 = vpop.f32.mrb[1].mxu0 }
  0xe1   :  { %v103_v53 = vmul.f32 0.16666667, %v100_v51 }
  0xe3   :  { %v104_v55 = vadd.f32 0.5, %v103_v53 }
  0xe5   :  { %v105_v56 = vmax.f32 %v104_v55, 0.0 }
  0xe7   :  { %v106_v58 = vmin.f32 %v105_v56, 1.0 }
  0xe9   :  { %v115_v61 = vrot.slane %v106_v58, %v114_v57 }
  0xeb   :  { %v116_v62 = vmul.f32 %v115_v61, %v107_v59  ;;  %v117_v63 = vmul.f32 %v115_v61, %v108_v60  ;;  %v118_v10 = vmul.f32 %v115_v61, %v109_v4  ;;  %v119_v11 = vmul.f32 %v115_v61, %v110_v5 }
  0xec   :  { %v120_v20 = vmul.f32 %v115_v61, %v111_v16 }
  0xed   :  { %v1187_v2 = vpack.c.bf16 %v117_v63, %v116_v62  ;;  %v122_v14 = vpack.c.bf16 %v119_v11, %v118_v10 }
  0xee   :  { %v123_v23 = vpack.c.bf16 %v120_v20, %v120_v20 }
  0xef   :  { %835 = vmatmul.mubr.msk.bf16.vlgmr.msra.gmra.mrb[0].mxu1 %vm454_vm3, %v1187_v2  ;;  %839 = vmatmul.mubr.msk.bf16.vlgmr.msra.gmra.mrb[4].mxu0 %vm454_vm3, %v1187_v2 }
  0xf0   :  { %609 = vmatpush1.bf16.msra.mxu1 %v963_v0  ;;  %877 = vmatpush3.bf16.msra.mxu0 %v966_v1 }
  0xf1   :  { %610 = vmatprep.subr.bf16.mxu1 %v969_v3  ;;  %878 = vmatprep.subr.bf16.mxu0 %v1020_v6 }
  0xf2   :  { %528 = vmatprep.mubr.bf16.mxu1 %v1021_v47  ;;  %589 = vmatprep.mubr.bf16.mxu0 %v1021_v47 }
  0xf4   :  { %611 = vmatpush1.bf16.msra.mxu1 %v967_v7  ;;  %879 = vmatpush3.bf16.msra.mxu0 %v970_v8 }
  0xf5   :  { %612 = vmatprep.subr.bf16.mxu1 %v973_v9  ;;  %880 = vmatprep.subr.bf16.mxu0 %v1020_v6 }
  0xf7   :  { %836 = vmatmul.mubr.msk.bf16.gmra.mrb[4].mxu1 %vm454_vm3, %v122_v14  ;;  %840 = vmatmul.mubr.msk.bf16.gmra.mrb[8].mxu0 %vm454_vm3, %v122_v14 }
  0xf8   :  { %613 = vmatpush1.bf16.msra.mxu1 %v971_v12  ;;  %881 = vmatpush3.bf16.msra.mxu0 %v974_v13 }
  0xf9   :  { %614 = vmatprep.subr.bf16.mxu1 %v977_v15  ;;  %882 = vmatprep.subr.bf16.mxu0 %v1020_v6 }
  0xfa   :  { %538 = vmatprep.mubr.bf16.mxu1 %v1021_v47  ;;  %599 = vmatprep.mubr.bf16.mxu0 %v1021_v47 }
  0xfc   :  { %615 = vmatpush1.bf16.msra.mxu1 %v975_v17  ;;  %883 = vmatpush3.bf16.msra.mxu0 %v978_v18 }
  0xfd   :  { %616 = vmatprep.subr.bf16.mxu1 %v981_v19  ;;  %884 = vmatprep.subr.bf16.mxu0 %v1020_v6 }
  0xff   :  { %837 = vmatmul.mubr.msk.bf16.gmra.mrb[8].mxu1 %vm454_vm3, %v123_v23  ;;  %841 = vmatmul.mubr.msk.bf16.gmra.mrb[12].mxu0 %vm454_vm3, %v123_v23 }
 0x100   :  { %617 = vmatpush1.bf16.msra.mxu1 %v979_v21  ;;  %885 = vmatpush3.bf16.msra.mxu0 %v982_v22 }
 0x101   :  { %618 = vmatprep.subr.bf16.mxu1 %v985_v24  ;;  %886 = vmatprep.subr.bf16.mxu0 %v1020_v6 }
 0x102   :  { %640 = vmatprep.mubr.bf16.mxu1 %v1021_v47  ;;  %892 = vmatprep.mubr.msk.bf16.mxu0 %vm1019_vm0, %v1020_v6 }
 0x104   :  { %619 = vmatpush1.bf16.msra.mxu1 %v983_v25  ;;  %887 = vmatpush3.bf16.msra.mxu0 %v986_v26 }
 0x105   :  { %620 = vmatprep.subr.bf16.mxu1 %v989_v27  ;;  %888 = vmatprep.subr.bf16.mxu0 %v1020_v6 }
 0x108   :  { %621 = vmatpush1.bf16.msra.mxu1 %v987_v29  ;;  %889 = vmatpush3.bf16.msra.mxu0 %v990_v30 }
 0x109   :  { %842 = vmatprep.subr.msk.bf16.mxu1 %vm464_vm2, %v832_v31  ;;  %890 = vmatprep.subr.bf16.mxu0 %v1020_v6 }
 0x10c   :  { %623 = vmatpush1.bf16.msra.mxu1 %v478_v34  ;;  %891 = vmatpush3.bf16.msra.mxu0 %v484_v35 }
 0x10f   :  { %843 = vmatmul.mubr.msk.bf16.vlgmr.msra.gmra.mrb[12].mxu1 %vm454_vm3, %v1187_v2  ;;  %893 = vmatmul.mubr.msk.bf16.vlgmr.msra.gmra.mrb[16].mxu0 %vm454_vm3, %v1187_v2 }
 0x110   :  { %650 = vmatprep.mubr.bf16.mxu1 %v1021_v47  ;;  %896 = vmatprep.mubr.msk.bf16.mxu0 %vm1019_vm0, %v1020_v6 }
 0x117   :  { %844 = vmatmul.mubr.msk.bf16.gmra.mrb[16].mxu1 %vm454_vm3, %v122_v14  ;;  %897 = vmatmul.mubr.msk.bf16.gmra.mrb[20].mxu0 %vm454_vm3, %v122_v14 }
 0x118   :  { %660 = vmatprep.mubr.bf16.mxu1 %v1021_v47  ;;  %900 = vmatprep.mubr.msk.bf16.mxu0 %vm1019_vm0, %v1020_v6 }
 0x11f   :  { %845 = vmatmul.mubr.msk.bf16.gmra.mrb[20].mxu1 %vm454_vm3, %v123_v23  ;;  %901 = vmatmul.mubr.msk.bf16.gmra.mrb[24].mxu0 %vm454_vm3, %v123_v23 }
 0x1c2   :  { %v520_v36 = vpop.f32.mrb[0].mxu1  ;;  %v581_v37 = vpop.f32.mrb[4].mxu0 }
 0x1c3   :  { %725 = vst [vmem:[#allocation2] sm:$0xff] %v520_v36  ;;  %727 = vst [vmem:[#allocation2 + $0x10] sm:$0xff] %v581_v37  ;;  %v522_v38 = vpop.f32.mrb[1].mxu1  ;;  %v583_v39 = vpop.f32.mrb[5].mxu0 }
 0x1c4   :  { %726 = vst [vmem:[#allocation2 + $0x8] sm:$0xff] %v522_v38  ;;  %728 = vst [vmem:[#allocation2 + $0x18] sm:$0xff] %v583_v39  ;;  %v524_v40 = vpop.f32.mrb[2].mxu1  ;;  %v585_v41 = vpop.f32.mrb[6].mxu0 }
 0x1c5   :  { %733 = vst [vmem:[#allocation2 + $0x38] sm:$0xff] %v524_v40  ;;  %735 = vst [vmem:[#allocation2 + $0x48] sm:$0xff] %v585_v41  ;;  %v526_v42 = vpop.f32.mrb[3].mxu1  ;;  %v587_v43 = vpop.f32.mrb[7].mxu0 }
 0x1c6   :  { %734 = vst [vmem:[#allocation2 + $0x40] sm:$0xff] %v526_v42  ;;  %736 = vst [vmem:[#allocation2 + $0x50] sm:$0xff] %v587_v43 }
 0x1ca   :  { %v530_v6 = vpop.f32.mrb[4].mxu1  ;;  %v591_v44 = vpop.f32.mrb[8].mxu0 }
 0x1cb   :  { %740 = vst [vmem:[#allocation2 + $0x70] sm:$0xff] %v530_v6  ;;  %742 = vst [vmem:[#allocation2 + $0x80] sm:$0xff] %v591_v44  ;;  %v532_v45 = vpop.f32.mrb[5].mxu1  ;;  %v593_v46 = vpop.f32.mrb[9].mxu0 }
 0x1cc   :  { %741 = vst [vmem:[#allocation2 + $0x78] sm:$0xff] %v532_v45  ;;  %743 = vst [vmem:[#allocation2 + $0x88] sm:$0xff] %v593_v46  ;;  %v534_v47 = vpop.f32.mrb[6].mxu1  ;;  %v595_v48 = vpop.f32.mrb[10].mxu0 }
 0x1cd   :  { %747 = vst [vmem:[#allocation2 + $0xa8] sm:$0xff] %v534_v47  ;;  %749 = vst [vmem:[#allocation2 + $0xb8] sm:$0xff] %v595_v48  ;;  %v536_v49 = vpop.f32.mrb[7].mxu1  ;;  %v597_v50 = vpop.f32.mrb[11].mxu0 }
 0x1ce   :  { %748 = vst [vmem:[#allocation2 + $0xb0] sm:$0xff] %v536_v49  ;;  %750 = vst [vmem:[#allocation2 + $0xc0] sm:$0xff] %v597_v50 }
 0x1d2   :  { %v540_v51 = vpop.f32.mrb[8].mxu1  ;;  %v601_v52 = vpop.f32.mrb[12].mxu0 }
 0x1d3   :  { %754 = vst [vmem:[#allocation2 + $0xe0] sm:$0xff] %v540_v51  ;;  %756 = vst [vmem:[#allocation2 + $0xf0] sm:$0xff] %v601_v52  ;;  %v542_v53 = vpop.f32.mrb[9].mxu1  ;;  %v603_v54 = vpop.f32.mrb[13].mxu0 }
 0x1d4   :  { %755 = vst [vmem:[#allocation2 + $0xe8] sm:$0xff] %v542_v53  ;;  %757 = vst [vmem:[#allocation2 + $0xf8] sm:$0xff] %v603_v54  ;;  %v544_v55 = vpop.f32.mrb[10].mxu1  ;;  %v605_v56 = vpop.f32.mrb[14].mxu0 }
 0x1d5   :  { %v545_v57 = vpop.f32.mrb[11].mxu1  ;;  %v606_v58 = vpop.f32.mrb[15].mxu0 }
 0x1e2   :  { %v642_v59 = vpop.f32.mrb[12].mxu1  ;;  %v703_v60 = vpop.f32.mrb[16].mxu0 }
 0x1e3   :  { %729 = vst [vmem:[#allocation2 + $0x20] sm:$0xff] %v642_v59  ;;  %732 = vst.msk [vmem:[#allocation2 + $0x30] sm:$0xff] %vm731_vm4, %v703_v60  ;;  %v644_v61 = vpop.f32.mrb[13].mxu1  ;;  %v894_v62 = vpop.f32.mrb[17].mxu0 }
 0x1e4   :  { %730 = vst [vmem:[#allocation2 + $0x28] sm:$0xff] %v644_v61  ;;  %v646_v63 = vpop.f32.mrb[14].mxu1  ;;  %v706_v0 = vpop.f32.mrb[18].mxu0 }
 0x1e5   :  { %737 = vst [vmem:[#allocation2 + $0x58] sm:$0xff] %v646_v63  ;;  %739 = vst.msk [vmem:[#allocation2 + $0x68] sm:$0xff] %vm731_vm4, %v706_v0  ;;  %v648_v1 = vpop.f32.mrb[15].mxu1  ;;  %v895_v2 = vpop.f32.mrb[19].mxu0 }
 0x1e6   :  { %738 = vst [vmem:[#allocation2 + $0x60] sm:$0xff] %v648_v1 }
 0x1ea   :  { %v652_v3 = vpop.f32.mrb[16].mxu1  ;;  %v711_v4 = vpop.f32.mrb[20].mxu0 }
 0x1eb   :  { %744 = vst [vmem:[#allocation2 + $0x90] sm:$0xff] %v652_v3  ;;  %746 = vst.msk [vmem:[#allocation2 + $0xa0] sm:$0xff] %vm731_vm4, %v711_v4  ;;  %v654_v5 = vpop.f32.mrb[17].mxu1  ;;  %v898_v7 = vpop.f32.mrb[21].mxu0 }
 0x1ec   :  { %745 = vst [vmem:[#allocation2 + $0x98] sm:$0xff] %v654_v5  ;;  %v656_v8 = vpop.f32.mrb[18].mxu1  ;;  %v714_v9 = vpop.f32.mrb[22].mxu0 }
 0x1ed   :  { %751 = vst [vmem:[#allocation2 + $0xc8] sm:$0xff] %v656_v8  ;;  %753 = vst.msk [vmem:[#allocation2 + $0xd8] sm:$0xff] %vm731_vm4, %v714_v9  ;;  %v658_v10 = vpop.f32.mrb[19].mxu1  ;;  %v899_v11 = vpop.f32.mrb[23].mxu0 }
 0x1ee   :  { %752 = vst [vmem:[#allocation2 + $0xd0] sm:$0xff] %v658_v10 }
 0x1f2   :  { %v662_v12 = vpop.f32.mrb[20].mxu1  ;;  %v719_v13 = vpop.f32.mrb[24].mxu0 }
 0x1f3   :  { %758 = vst [vmem:[#allocation2 + $0x100] sm:$0xff] %v662_v12  ;;  %760 = vst.msk [vmem:[#allocation2 + $0x110] sm:$0xff] %vm731_vm4, %v719_v13  ;;  %v664_v14 = vpop.f32.mrb[21].mxu1  ;;  %v902_v15 = vpop.f32.mrb[25].mxu0 }
 0x1f4   :  { %759 = vst [vmem:[#allocation2 + $0x108] sm:$0xff] %v664_v14  ;;  %v666_v16 = vpop.f32.mrb[22].mxu1  ;;  %v722_v17 = vpop.f32.mrb[26].mxu0 }
 0x1f5   :  { %v667_v18 = vpop.f32.mrb[23].mxu1  ;;  %v903_v19 = vpop.f32.mrb[27].mxu0 }
 0x1f6   :  { %1005 = shalt.err (!%p1002_p4)
}
 0x1f7   :  { %s1006_s12 = scalar_lea.hbm %s1326_s5, 4480 }
 0x1f8   :  { %p1007_p5 = scmp.ne.s32.totalorder %s1326_s5, %s1006_s12  ;;  %p1010_p6 = scmp.lt.u32.totalorder %s1006_s12, %s1326_s5 }
 0x1fa   :  { %p1012_p7 = pnand %p1010_p6, %p1007_p5 }
 0x1fc   :  { %1015 = shalt.err (!%p1012_p7)
}
 0x1fd   :  { %s1023_s4 = smov 896   ;;  %s1024_s16 = smov 56  }
 0x1fe   :  { %772 = dma.vmem_to_hbm [thread:$0]  %s1301_s9, 4480, %s1326_s5, [#allocation3], %s1023_s4, %s1023_s4, %s1024_s16  }
 0x1ff   :  { %1016 = dma.done.wait [#allocation3], 4480  }
 0x200   :  { %1017 = vsyncadd [#allocation3], 4294962816 }
 0x201   :  { %776 = vsyncpa [#allocation3], 1 }

</bundles_post_ra>
